<compile_context>
chip_gen: v7x
topology: tpu7x:2x2x1
jax: 0.10.0
libtpu: 0.0.40
codegen_flags: <defaults>
</compile_context>

<pallas_src>
import jax
import jax.numpy as jnp
from jax.experimental import pallas as pl
from jax.experimental.pallas import tpu as pltpu

_NUM_CAT = 26
_NUM_CONT = 3
_HEAD_LANES = 128   # fused cat+cont head, zero-padded to one 128-lane block


def _round_up(x, m):
    return (x + m - 1) // m * m


# ----------------------------------------------------------------------------
# Kernel
# ----------------------------------------------------------------------------
def _emotic_face_kernel(x_ref, wbb_ref, bbb_ref, whead_ref, bhead_ref,
                        out_ref, pool_acc_ref):
    """Grid = (batch tiles ["parallel"], spatial tiles ["arbitrary", reduction])."""
    j = pl.program_id(1)

    @pl.when(j == 0)
    def _init():
        pool_acc_ref[...] = jnp.zeros_like(pool_acc_ref)

    # Partial spatial sum for this tile, accumulated in float32. The 1/(H*W)
    # mean scale is folded into the backbone weight at param-prep time.
    pool_acc_ref[...] += jnp.sum(x_ref[...].astype(jnp.float32), axis=-1)

    @pl.when(j == pl.num_programs(1) - 1)
    def _finalize():
        # Backbone: Linear(C -> F_pad) + ReLU (bias/ReLU kept in f32).
        pooled = pool_acc_ref[...].astype(wbb_ref.dtype)              # (TB, C)
        feat = jnp.dot(pooled, wbb_ref[...],
                       preferred_element_type=jnp.float32)
        feat = jnp.maximum(feat + bbb_ref[...].astype(jnp.float32), 0.0)

        # Fused fc_cat + fc_cont: single lane-dense (TB, 128) matmul + store.
        out = jnp.dot(feat.astype(whead_ref.dtype), whead_ref[...],
                      preferred_element_type=jnp.float32)
        out_ref[...] = (out + bhead_ref[...].astype(jnp.float32)
                        ).astype(out_ref.dtype)


# ----------------------------------------------------------------------------
# Parameter preparation (one-time, outside the hot path)
# ----------------------------------------------------------------------------
def prepare_params(raw_params, spatial_size, dtype=jnp.float32):
    """Fold the GAP 1/(H*W) scale into the backbone weight, pad F to a multiple
    of 128 lanes, and fuse/zero-pad fc_cat + fc_cont into one (F_pad, 128) head.
    dtype=jnp.bfloat16 is the recommended inference setting for the MXU-side
    weights (pair with a bf16 x_face); biases stay f32."""
    w_bb, b_bb, w_cat, b_cat, w_cont, b_cont = raw_params
    C, F = w_bb.shape
    F_pad = _round_up(F, 128)

    w_bb_p = jnp.zeros((C, F_pad), jnp.float32).at[:, :F].set(
        w_bb / float(spatial_size))
    b_bb_p = jnp.zeros((1, F_pad), jnp.float32).at[:, :F].set(
        b_bb.reshape(1, F))

    w_head = jnp.zeros((F_pad, _HEAD_LANES), jnp.float32)
    w_head = w_head.at[:F, :_NUM_CAT].set(w_cat)
    w_head = w_head.at[:F, _NUM_CAT:_NUM_CAT + _NUM_CONT].set(w_cont)
    b_head = jnp.zeros((1, _HEAD_LANES), jnp.float32)
    b_head = b_head.at[:, :_NUM_CAT].set(b_cat.reshape(1, _NUM_CAT))
    b_head = b_head.at[:, _NUM_CAT:_NUM_CAT + _NUM_CONT].set(
        b_cont.reshape(1, _NUM_CONT))

    return (w_bb_p.astype(dtype), b_bb_p,
            w_head.astype(dtype), b_head)


# ----------------------------------------------------------------------------
# Per-generation VMEM sizing / spatial-tile choice
# ----------------------------------------------------------------------------
def _vmem_budget_and_limit():
    """(x double-buffer budget, compiler vmem_limit_bytes) per TPU generation.
    v5e/v6e: 128 MiB physical VMEM -> larger tiles / longer DMA runs.
    v7x: 64 MiB per TensorCore -> stay conservative."""
    try:
        vmem_cap = pltpu.get_tpu_info().vmem_capacity_bytes
    except Exception:
        vmem_cap = 64 << 20                     # unknown backend: assume tightest (v7x)
    if vmem_cap >= (100 << 20):                 # v5e / v6e
        return 48 << 20, 96 << 20
    return 24 << 20, 48 << 20                   # v7x


def _choose_spatial_tile(hw, tb, c, itemsize, budget_bytes):
    """Largest spatial tile (multiple of 128 dividing hw) whose double-buffered
    x block stays within `budget_bytes` (accounting for the C->8 sublane pad).
    With the per-generation budgets this yields multi-KiB DMA runs whenever HW
    allows; never ship a 128-wide tile outside the self-test."""
    if hw % 128 != 0:
        return hw                               # full-extent last dim is legal
    c_pad = _round_up(c, 8)
    cap = max(128, (budget_bytes // (2 * tb * c_pad * itemsize)) // 128 * 128)
    t = min(hw, cap)
    while hw % t != 0:
        t -= 128
    return max(t, 128)


# ----------------------------------------------------------------------------
# Wrapper
# ----------------------------------------------------------------------------
def emotic_single_face(x_context, x_body, x_face, prepared_params,
                       *, spatial_tile=None):
    """Pallas implementation of EmoticSingleFace.forward.

    x_context / x_body are accepted (to match the PyTorch signature) but unused,
    exactly as in the reference forward pass. `prepared_params` comes from
    prepare_params(). Recommended inference path: pass x_face in bfloat16 and
    prepare_params(dtype=jnp.bfloat16); accumulation stays float32 in-kernel.
    """
    del x_context, x_body  # unused in the reference forward
    w_bb, b_bb, w_head, b_head = prepared_params
    B, C, H, W = x_face.shape
    HW = H * W
    F_pad = w_bb.shape[1]
    assert w_bb.shape[0] == C

    x_dtype = x_face.dtype
    itemsize = jnp.dtype(x_dtype).itemsize
    x_flat = x_face.reshape(B, C, HW)

    budget, vmem_limit = _vmem_budget_and_limit()

    # Batch tile: sublane-aligned; capped so that >=2 "parallel" batch blocks
    # exist whenever B > 8 (both v7x TensorCores stream HBM). x itself is NOT
    # padded: the last batch block is partial and its junk rows never mix with
    # real rows (all ops are row-wise); only the tiny head output is padded.
    TB = min(128, _round_up(B, 8), max(8, _round_up(pl.cdiv(B, 2), 8)))
    n_btiles = pl.cdiv(B, TB)
    B_out = n_btiles * TB
    C_pad = _round_up(C, 8)

    # If HW isn't 128-divisible and a full-extent spatial block would blow the
    # budget, zero-pad the spatial dim (zeros are exact: 1/(true H*W) is already
    # folded into w_bb).
    if HW % 128 != 0 and 2 * TB * C_pad * HW * itemsize > budget:
        HW_new = _round_up(HW, 128)
        x_flat = jnp.pad(x_flat, ((0, 0), (0, 0), (0, HW_new - HW)))
        HW = HW_new

    if spatial_tile is None:
        THW = _choose_spatial_tile(HW, TB, C, itemsize, budget)
    else:
        THW = int(spatial_tile)
        if HW % THW != 0 or not (THW % 128 == 0 or THW == HW):
            raise ValueError(f"spatial_tile={THW} must divide HW={HW} and be a "
                             f"multiple of 128 (or equal HW)")
        if 2 * TB * C_pad * THW * itemsize > budget:
            raise ValueError(f"spatial_tile={THW} exceeds the per-generation "
                             f"VMEM double-buffer budget ({budget} bytes)")

    grid = (n_btiles, HW // THW)

    # Advisory cost estimate (pooling counted as adds; x counted unpadded).
    flops = B * C * HW + 2 * B_out * (C * F_pad + F_pad * _HEAD_LANES)
    bytes_accessed = (B * C * HW * itemsize
                      + sum(int(a.size) * jnp.dtype(a.dtype).itemsize
                            for a in prepared_params)
                      + B_out * _HEAD_LANES * 4)

    out = pl.pallas_call(
        _emotic_face_kernel,
        out_shape=jax.ShapeDtypeStruct((B_out, _HEAD_LANES), jnp.float32),
        grid_spec=pltpu.PrefetchScalarGridSpec(
            num_scalar_prefetch=0,
            grid=grid,
            in_specs=[
                pl.BlockSpec((TB, C, THW), lambda i, j: (i, 0, j)),
                pl.BlockSpec((C, F_pad), lambda i, j: (0, 0)),
                pl.BlockSpec((1, F_pad), lambda i, j: (0, 0)),
                pl.BlockSpec((F_pad, _HEAD_LANES), lambda i, j: (0, 0)),
                pl.BlockSpec((1, _HEAD_LANES), lambda i, j: (0, 0)),
            ],
            out_specs=pl.BlockSpec((TB, _HEAD_LANES), lambda i, j: (i, 0)),
            scratch_shapes=[pltpu.VMEM((TB, C), jnp.float32)],
        ),
        compiler_params=pltpu.CompilerParams(
            dimension_semantics=("parallel", "arbitrary"),
            vmem_limit_bytes=int(vmem_limit),
        ),
        cost_estimate=pl.CostEstimate(
            flops=int(flops), transcendentals=0,
            bytes_accessed=int(bytes_accessed)),
    )(x_flat, w_bb, b_bb, w_head, b_head)

    cat_out = out[:B, :_NUM_CAT]
    cont_out = out[:B, _NUM_CAT:_NUM_CAT + _NUM_CONT]
    return cat_out, cont_out


# ----------------------------------------------------------------------------
# Init + reference
# ----------------------------------------------------------------------------
def init_params(key, in_channels, num_face_features):
    """Deterministic PyTorch-style Linear init: U(-1/sqrt(fan_in), 1/sqrt(fan_in))."""
    ks = jax.random.split(key, 6)

    def linear(kw, kb, fan_in, fan_out):
        bound = 1.0 / jnp.sqrt(jnp.float32(fan_in))
        w = jax.random.uniform(kw, (fan_in, fan_out), jnp.float32, -bound, bound)
        b = jax.random.uniform(kb, (1, fan_out), jnp.float32, -bound, bound)
        return w, b

    w_bb, b_bb = linear(ks[0], ks[1], in_channels, num_face_features)   # backbone
    w_cat, b_cat = linear(ks[2], ks[3], num_face_features, _NUM_CAT)    # fc_cat
    w_cont, b_cont = linear(ks[4], ks[5], num_face_features, _NUM_CONT) # fc_cont
    return (w_bb, b_bb, w_cat, b_cat, w_cont, b_cont)


def _reference(x_face, raw_params):
    """Pure-JAX reference for correctness check."""
    w_bb, b_bb, w_cat, b_cat, w_cont, b_cont = raw_params
    pooled = jnp.mean(x_face.astype(jnp.float32), axis=(2, 3))
    feat = jnp.maximum(pooled @ w_bb + b_bb, 0.0)
    return feat @ w_cat + b_cat, feat @ w_cont + b_cont


if __name__ == "__main__":
    # Small shapes consistent with the module: batch=2, face image 4x16x16,
    # num_face_features=32.
    B, C, H, W = 2, 4, 16, 16
    NUM_FACE_FEATURES = 32

    key = jax.random.PRNGKey(0)
    k_ctx, k_body, k_face, k_params = jax.random.split(key, 4)

    x_context = jax.random.normal(k_ctx, (B, 3, 16, 16), jnp.float32)   # unused
    x_body = jax.random.normal(k_body, (B, 3, 16, 16), jnp.float32)     # unused
    x_face = jax.random.normal(k_face, (B, C, H, W), jnp.float32)

    raw_params = init_params(k_params, C, NUM_FACE_FEATURES)
    ref_cat, ref_cont = _reference(x_face, raw_params)

    # --- f32 path (tight tolerance). spatial_tile=128 is self-test-only: it
    # forces a 2-step spatial reduction so the accumulator / pl.when path runs.
    prepared_f32 = prepare_params(raw_params, spatial_size=H * W)
    cat_out, cont_out = emotic_single_face(x_context, x_body, x_face,
                                           prepared_f32, spatial_tile=128)
    jax.block_until_ready((cat_out, cont_out))
    assert cat_out.shape == (B, _NUM_CAT) and cont_out.shape == (B, _NUM_CONT)
    assert jnp.allclose(cat_out, ref_cat, atol=1e-4, rtol=1e-4)
    assert jnp.allclose(cont_out, ref_cont, atol=1e-4, rtol=1e-4)

    # --- bf16 path (recommended inference config): bf16 x + bf16 MXU weights,
    # f32 accumulation, auto-chosen spatial tile; looser tolerance for bf16 I/O.
    prepared_bf16 = prepare_params(raw_params, spatial_size=H * W,
                                   dtype=jnp.bfloat16)
    cat_bf, cont_bf = emotic_single_face(x_context, x_body,
                                         x_face.astype(jnp.bfloat16),
                                         prepared_bf16)
    jax.block_until_ready((cat_bf, cont_bf))
    assert jnp.allclose(cat_bf, ref_cat, atol=5e-2, rtol=5e-2)
    assert jnp.allclose(cont_bf, ref_cont, atol=5e-2, rtol=5e-2)

    print("KERNEL_OK")
</pallas_src>

<mosaic_0001>
module attributes {stable_mosaic.version = 11 : i64} {
  func.func @_emotic_face_kernel(%arg0: i32, %arg1: i32, %arg2: memref<8x4x128xf32, #tpu.memory_space<vmem>>, %arg3: memref<4x128xf32, #tpu.memory_space<vmem>>, %arg4: memref<1x128xf32, #tpu.memory_space<vmem>>, %arg5: memref<128x128xf32, #tpu.memory_space<vmem>>, %arg6: memref<1x128xf32, #tpu.memory_space<vmem>>, %arg7: memref<8x128xf32, #tpu.memory_space<vmem>>, %arg8: memref<8x4xf32, #tpu.memory_space<vmem>>) attributes {dimension_semantics = [#tpu.dimension_semantics<parallel>, #tpu.dimension_semantics<arbitrary>], iteration_bounds = array<i64: 1, 2>, scalar_prefetch = 0 : i64, scratch_operands = 1 : i64, tpu.core_type = #tpu.core_type<tc>, window_params = [{transform_indices = @transform_0, window_bounds = array<i64: 8, 4, 128>}, {pipeline_mode = #tpu.pipeline_mode<synchronous>, transform_indices = @transform_1, window_bounds = array<i64: 4, 128>}, {pipeline_mode = #tpu.pipeline_mode<synchronous>, transform_indices = @transform_2, window_bounds = array<i64: 1, 128>}, {pipeline_mode = #tpu.pipeline_mode<synchronous>, transform_indices = @transform_3, window_bounds = array<i64: 128, 128>}, {pipeline_mode = #tpu.pipeline_mode<synchronous>, transform_indices = @transform_4, window_bounds = array<i64: 1, 128>}, {transform_indices = @transform_5, window_bounds = array<i64: 8, 128>}]} {
    %c0_i32 = arith.constant 0 : i32
    %0 = arith.cmpi eq, %arg1, %c0_i32 : i32
    %1 = arith.extui %0 : i1 to i32
    %c0_i32_0 = arith.constant 0 : i32
    %2 = arith.cmpi ne, %1, %c0_i32_0 : i32
    scf.if %2 {
      %cst_8 = arith.constant 0.000000e+00 : f32
      %11 = vector.broadcast %cst_8 : f32 to vector<8x4xf32>
      %c0_9 = arith.constant 0 : index
      %c0_10 = arith.constant 0 : index
      %12 = vector.load %arg8[%c0_9, %c0_10] : memref<8x4xf32, #tpu.memory_space<vmem>>, vector<8x4xf32>
      tpu.vector_store %arg8[%c0_9, %c0_10], %11 {strides = array<i32>} : memref<8x4xf32, #tpu.memory_space<vmem>>, vector<8x4xf32>,
    } else {
    }
    %c0 = arith.constant 0 : index
    %c0_1 = arith.constant 0 : index
    %3 = vector.load %arg8[%c0, %c0_1] : memref<8x4xf32, #tpu.memory_space<vmem>>, vector<8x4xf32>
    %c0_2 = arith.constant 0 : index
    %c0_3 = arith.constant 0 : index
    %c0_4 = arith.constant 0 : index
    %4 = vector.load %arg2[%c0_2, %c0_3, %c0_4] : memref<8x4x128xf32, #tpu.memory_space<vmem>>, vector<8x4x128xf32>
    %cst = arith.constant dense<0.000000e+00> : vector<8x4xf32>
    %5 = vector.multi_reduction <add>, %4, %cst [2] : vector<8x4x128xf32> to vector<8x4xf32>
    %6 = arith.addf %3, %5 : vector<8x4xf32>
    %c0_5 = arith.constant 0 : index
    %c0_6 = arith.constant 0 : index
    %7 = vector.load %arg8[%c0_5, %c0_6] : memref<8x4xf32, #tpu.memory_space<vmem>>, vector<8x4xf32>
    tpu.vector_store %arg8[%c0_5, %c0_6], %6 {strides = array<i32>} : memref<8x4xf32, #tpu.memory_space<vmem>>, vector<8x4xf32>,
    %c1_i32 = arith.constant 1 : i32
    %8 = arith.cmpi eq, %arg1, %c1_i32 : i32
    %9 = arith.extui %8 : i1 to i32
    %c0_i32_7 = arith.constant 0 : i32
    %10 = arith.cmpi ne, %9, %c0_i32_7 : i32
    scf.if %10 {
      %c0_8 = arith.constant 0 : index
      %c0_9 = arith.constant 0 : index
      %11 = vector.load %arg8[%c0_8, %c0_9] : memref<8x4xf32, #tpu.memory_space<vmem>>, vector<8x4xf32>
      %c0_10 = arith.constant 0 : index
      %c0_11 = arith.constant 0 : index
      %12 = vector.load %arg3[%c0_10, %c0_11] : memref<4x128xf32, #tpu.memory_space<vmem>>, vector<4x128xf32>
      %cst_12 = arith.constant dense<0.000000e+00> : vector<8x128xf32>
      %13 = tpu.matmul %11, %12, %cst_12 {dimension_numbers = #tpu.dot_dimension_numbers<[1], [0], [0], [1], [0, 0, 1, 1], [], []>} : vector<8x4xf32>, vector<4x128xf32>, vector<8x128xf32> -> vector<8x128xf32>
      %c0_13 = arith.constant 0 : index
      %c0_14 = arith.constant 0 : index
      %14 = vector.load %arg4[%c0_13, %c0_14] : memref<1x128xf32, #tpu.memory_space<vmem>>, vector<1x128xf32>
      %15 = vector.broadcast %14 : vector<1x128xf32> to vector<8x128xf32>
      %16 = arith.addf %13, %15 : vector<8x128xf32>
      %cst_15 = arith.constant 0.000000e+00 : f32
      %17 = vector.broadcast %cst_15 : f32 to vector<8x128xf32>
      %18 = arith.maximumf %16, %17 : vector<8x128xf32>
      %c0_16 = arith.constant 0 : index
      %c0_17 = arith.constant 0 : index
      %19 = vector.load %arg5[%c0_16, %c0_17] : memref<128x128xf32, #tpu.memory_space<vmem>>, vector<128x128xf32>
      %cst_18 = arith.constant dense<0.000000e+00> : vector<8x128xf32>
      %20 = tpu.matmul %18, %19, %cst_18 {dimension_numbers = #tpu.dot_dimension_numbers<[1], [0], [0], [1], [0, 0, 1, 1], [], []>} : vector<8x128xf32>, vector<128x128xf32>, vector<8x128xf32> -> vector<8x128xf32>
      %c0_19 = arith.constant 0 : index
      %c0_20 = arith.constant 0 : index
      %21 = vector.load %arg6[%c0_19, %c0_20] : memref<1x128xf32, #tpu.memory_space<vmem>>, vector<1x128xf32>
      %22 = vector.broadcast %21 : vector<1x128xf32> to vector<8x128xf32>
      %23 = arith.addf %20, %22 : vector<8x128xf32>
      %c0_21 = arith.constant 0 : index
      %c0_22 = arith.constant 0 : index
      %24 = vector.load %arg7[%c0_21, %c0_22] : memref<8x128xf32, #tpu.memory_space<vmem>>, vector<8x128xf32>
      tpu.vector_store %arg7[%c0_21, %c0_22], %23 {strides = array<i32>} : memref<8x128xf32, #tpu.memory_space<vmem>>, vector<8x128xf32>,
    } else {
    }
    return
  }
  func.func @transform_0(%arg0: i32, %arg1: i32) -> (i32, i32, i32) {
    %c0_i32 = arith.constant 0 : i32
    %c0_i32_0 = arith.constant 0 : i32
    return %arg0, %c0_i32, %arg1 : i32, i32, i32
  }
  func.func @transform_1(%arg0: i32, %arg1: i32) -> (i32, i32) {
    %c0_i32 = arith.constant 0 : i32
    %c0_i32_0 = arith.constant 0 : i32
    %c0_i32_1 = arith.constant 0 : i32
    return %c0_i32, %c0_i32_0 : i32, i32
  }
  func.func @transform_2(%arg0: i32, %arg1: i32) -> (i32, i32) {
    %c0_i32 = arith.constant 0 : i32
    %c0_i32_0 = arith.constant 0 : i32
    %c0_i32_1 = arith.constant 0 : i32
    return %c0_i32, %c0_i32_0 : i32, i32
  }
  func.func @transform_3(%arg0: i32, %arg1: i32) -> (i32, i32) {
    %c0_i32 = arith.constant 0 : i32
    %c0_i32_0 = arith.constant 0 : i32
    %c0_i32_1 = arith.constant 0 : i32
    return %c0_i32, %c0_i32_0 : i32, i32
  }
  func.func @transform_4(%arg0: i32, %arg1: i32) -> (i32, i32) {
    %c0_i32 = arith.constant 0 : i32
    %c0_i32_0 = arith.constant 0 : i32
    %c0_i32_1 = arith.constant 0 : i32
    return %c0_i32, %c0_i32_0 : i32, i32
  }
  func.func @transform_5(%arg0: i32, %arg1: i32) -> (i32, i32) {
    %c0_i32 = arith.constant 0 : i32
    %c0_i32_0 = arith.constant 0 : i32
    return %arg0, %c0_i32 : i32, i32
  }
}

</mosaic_0001>

<bundles_post_ra>
// kernel: tpu_custom_call.1
= control target key start
LH: loop header
LB: loop body
LE: loop exit
PB: predicated region body
PF: predicated region fallthrough
CT: control target
= control target key end

     0   :  { %10 = vsyncpa [#allocation4], 0  ;;  %s1288_s0 = inlined_call_operand.hbm [shape: f32[2,4,256], index: 0, kind: input, shape index: {}]   ;;  %s1289_s1 = inlined_call_operand.hbm [shape: f32[4,128], index: 1, kind: input, shape index: {}]   ;;  %s1290_s2 = inlined_call_operand.vmem [shape: f32[1,128], index: 2, kind: input, shape index: {}]   ;;  %s1291_s3 = inlined_call_operand.hbm [shape: f32[128,128], index: 3, kind: input, shape index: {}]   ;;  %s1292_s4 = inlined_call_operand.vmem [shape: f32[1,128], index: 4, kind: input, shape index: {}]   ;;  %s1293_s5 = inlined_call_operand.hbm [shape: f32[8,128], index: 5, kind: output, shape index: {}]  }
   0x1   :  { %12 = vsyncpa [#allocation4 + $0x1], 0 }
   0x2   :  { %13 = vsyncpa [#allocation7], 0 }
   0x3   :  { %14 = vsyncpa [#allocation5], 0  ;;  %s1060_s18 = smov 0   ;;  %s1062_s19 = smov 0  }
   0x4   :  { %s1064_s20 = smov 0   ;;  %s1066_s21 = smov 0  }
   0x5   :  { %s1068_s22 = smov 0   ;;  %s1070_s23 = smov 0  }
   0x6 LB: > { %s661_s24 = sadd.s32 4294967295, %s1015_s23   ;;  %s29_s25 = sadd.s32 1, %s1011_s22  ;;  %s1015_s23 = sphi %s1070_s23, %s20_s23   ;;  %s1011_s22 = sphi %s1068_s22, %s1312_s22   ;;  %s1007_s21 = sphi %s1066_s21, %s1311_s21   ;;  %s1003_s20 = sphi %s1064_s20, %s1310_s20   ;;  %s999_s19 = sphi %s1062_s19, %s1309_s19   ;;  %s995_s18 = sphi %s1060_s18, %s1308_s18  }
   0x7   : > { %p30_p0 = scmp.ge.s32.totalorder %s29_s25, 2  ;;  %s41_s26 = sadd.s32 1, %s1003_s20 }
   0x8   : > { %p48_p1 = scmp.ne.s32.totalorder %s1003_s20, %s999_s19  ;;  %p49_p2 = scmp.eq.s32.totalorder %s1015_s23, 0 }
   0x9   : > { %s1314_s25 = smov (%p30_p0, %s29_s25), 0  ;;  %p54_p4 = scmp.ne.s32.totalorder %s999_s19, %s995_s18 }
   0xa   : > { %p1096_p3 = por %p49_p2, %p48_p1  ;;  %s37_s28 = ssub.s32 %s1011_s22, %s1314_s25 }
   0xb   : > { %p1105_p5 = scmp.eq.s32.totalorder %s661_s24, 0  ;;  %p39_p6 = scmp.eq.s32.totalorder %s37_s28, 0 }
   0xc   : > { %s1298_s27 = scalar_select %p1096_p3, 1, 0 }
   0xd   : > { %s1299_s29 = scalar_select %p1105_p5, 1, 0 }
   0xe   : > { %p662_p7 = scmp.ge.s32.totalorder %s1015_s23, 1  ;;  %p1112_p8 = por %p1105_p5, %p54_p4 }
   0xf   : > { %p175_p9 = scmp.lt.s32.totalorder %s1015_s23, 3  ;;  %s1017_s8 = smov [#allocation6]  }
  0x10   : > { %s1300_s30 = scalar_select %p1112_p8, 1, 0 }
  0x11   : > { %s1118_s6 = scalar_select %p39_p6, %s1003_s20, %s41_s26  }
  0x12   : > { %p1120_p10 = pnand %p662_p7, %p175_p9  ;;  %s188_s9 = sshll.u32 %s1017_s8, 4  ;;  %s189_s9 = int_to_ptr.vmem [resolvable:$true] %s188_s9 }
  0x13   : > { %s1018_s10 = smov [#allocation8]   ;;  %s851_s15 = scalar_lea.hbm %s1289_s1, 64 }
  0x14   : > { %s1301_s7 = scalar_select %p1120_p10, 1, 0 }
  0x15   : > { %p778_p11 = pneg %p1120_p10  ;;  %s201_s11 = sshll.u32 %s1018_s10, 4  ;;  %s1132_s11 = int_to_ptr.vmem [resolvable:$true] %s201_s11 }
  0x16   : > { %p852_p13 = scmp.ne.s32.totalorder %s1289_s1, %s851_s15  ;;  %p858_p4 = scmp.lt.u32.totalorder %s851_s15, %s1289_s1 }
  0x17   : > { %p1128_p12 = pnand %p778_p11, %p1105_p5 }
  0x19   : > { %p853_p0 = pneg %p1128_p12 }
  0x1b   : > { %p854_p1 = pnand %p853_p0, %p852_p13 }
  0x1d   : > { %p855_p2 = pneg %p854_p1 }
  0x1f   : > { %p860_p6 = pnand %p858_p4, %p855_p2 }
  0x21   : > { %863 = shalt.err (!%p860_p6)
}
  0x22   : > { %s864_s28 = scalar_lea.vmem %s189_s9, 64  ;;  %p872_p5 = scmp.lt.s32.totalorder %s189_s9, %s189_s9 }
  0x23   : > { %p865_p7 = scmp.ne.s32.totalorder %s189_s9, %s864_s28  ;;  %p873_p8 = scmp.lt.s32.totalorder %s864_s28, %s864_s28 }
  0x25   : > { %p867_p9 = pnand %p865_p7, %p853_p0  ;;  %p874_p10 = por %p873_p8, %p872_p5 }
  0x27   : > { %p868_p11 = pneg %p867_p9 }
  0x29   : > { %p875_p3 = pnand %p874_p10, %p868_p11 }
  0x2b   : > { %878 = shalt.err (!%p875_p3)
}
  0x2c   : > { %781 = dma.hbm_to_vmem [thread:$0]  (!%p1128_p12), %s1289_s1, 64, %s189_s9, [#allocation7]  }
  0x2d   : > { %s879_s15 = scalar_lea.hbm %s1291_s3, 2048 }
  0x2e   : > { %p880_p13 = scmp.ne.s32.totalorder %s1291_s3, %s879_s15  ;;  %p886_p3 = scmp.lt.u32.totalorder %s879_s15, %s1291_s3 }
  0x30   : > { %p882_p5 = pnand %p880_p13, %p853_p0 }
  0x32   : > { %p883_p8 = pneg %p882_p5 }
  0x34   : > { %p888_p10 = pnand %p886_p3, %p883_p8 }
  0x36   : > { %891 = shalt.err (!%p888_p10)
}
  0x37   : > { %s892_s9 = scalar_lea.vmem %s1132_s11, 2048  ;;  %p900_p6 = scmp.lt.s32.totalorder %s1132_s11, %s1132_s11 }
  0x38   : > { %p893_p1 = scmp.ne.s32.totalorder %s1132_s11, %s892_s9  ;;  %p901_p7 = scmp.lt.s32.totalorder %s892_s9, %s892_s9 }
  0x3a   : > { %p895_p2 = pnand %p893_p1, %p853_p0  ;;  %p902_p9 = por %p901_p7, %p900_p6 }
  0x3c   : > { %p896_p4 = pneg %p895_p2 }
  0x3e   : > { %p903_p11 = pnand %p902_p9, %p896_p4 }
  0x40   : > { %906 = shalt.err (!%p903_p11)
}
  0x41   : > { %s1019_s28 = smov 128   ;;  %s1020_s8 = smov 8  }
  0x42   : > { %784 = dma.hbm_to_vmem [thread:$0]  (!%p1128_p12), %s1291_s3, 2048, %s1132_s11, [#allocation7], %s1019_s28, %s1019_s28, %s1020_s8  }
  0x43   : > { %p665_p13 = scmp.ge.s32.totalorder %s1015_s23, 2 }
  0x44   : > { %p1303_p0 = scmp.ne.s32.totalorder (!%p665_p13), %s1298_s27, 0 }
  0x45   : > { %214 = sbr.rel (%p665_p13) target bundleno = 108 (0x6c), region = 32 }
  0x4c   : > { %217 = sbr.rel (!%p1303_p0) target bundleno = 108 (0x6c), region = 36  ;;  %s218_s14 = sand.u32 (%p1303_p0), 1, %s1003_s20  }
  0x4d   : > { %s666_s15 = sshll.u32 (%p1303_p0), %s218_s14, 5  ;;  %s1185_s16 = scalar_lea.sflag (%p1303_p0), [#allocation4], %s218_s14 }
  0x4e   : > { %s222_s17 = scalar_lea.vmem (%p1303_p0), [#allocation3], %s666_s15 }
  0x53   : > { %228 = vsyncadd %s1185_s16, 384  ;;  %s667_s12 = sshll.u32 %s1011_s22, 6  ;;  %s235_s18 = sshll.u32 %s222_s17, 4  ;;  %s1194_s18 = int_to_ptr.vmem [resolvable:$true] %s235_s18 }
  0x54   : > { %s1192_s11 = scalar_lea.hbm %s1288_s0, %s667_s12  ;;  %s909_s10 = scalar_lea.hbm %s1288_s0, 256 }
  0x55   : > { %s907_s27 = scalar_lea.hbm %s1192_s11, 128  ;;  %p910_p5 = scmp.lt.u32.totalorder %s1192_s11, %s1288_s0 }
  0x56   : > { %p908_p12 = scmp.ne.s32.totalorder %s1192_s11, %s907_s27  ;;  %p911_p8 = scmp.lt.u32.totalorder %s909_s10, %s907_s27 }
  0x57   : > { %p913_p10 = scmp.lt.u32.totalorder %s907_s27, %s1192_s11 }
  0x58   : > { %p912_p3 = por %p911_p8, %p910_p5 }
  0x5a   : > { %p914_p1 = por %p913_p10, %p912_p3 }
  0x5c   : > { %p915_p2 = pnand %p914_p1, %p908_p12 }
  0x5e   : > { %918 = shalt.err (!%p915_p2)
}
  0x5f   : > { %s919_s15 = scalar_lea.vmem %s1194_s18, 128  ;;  %s1021_s17 = smov [#allocation3]  }
  0x60   : > { %p920_p4 = scmp.ne.s32.totalorder %s1194_s18, %s919_s15  ;;  %s921_s12 = sshll.u32 %s1021_s17, 4  ;;  %s922_s12 = int_to_ptr.vmem [resolvable:$false] %s921_s12 }
  0x61   : > { %s923_s26 = scalar_lea.vmem %s922_s12, 1024  ;;  %p924_p6 = scmp.lt.s32.totalorder %s1194_s18, %s922_s12 }
  0x62   : > { %p925_p7 = scmp.lt.s32.totalorder %s923_s26, %s919_s15 }
  0x64   : > { %p926_p9 = por %p925_p7, %p924_p6 }
  0x66   : > { %p927_p11 = pnand %p926_p9, %p920_p4 }
  0x68   : > { %930 = shalt.err (!%p927_p11)
}
  0x69   : > { %s1022_s9 = smov 128   ;;  %s1023_s27 = smov 64  }
  0x6a   : > { %s1024_s28 = smov 4  }
  0x6b   : > { %241 = dma.hbm_to_vmem [thread:$0]  %s1192_s11, 128, %s1194_s18, %s1185_s16, %s1022_s9, %s1023_s27, %s1024_s28  }
  0x6c PF: > { %p1304_p13 = scmp.ne.s32.totalorder %s1301_s7, 0 }
  0x6d   : > { %s249_s8 = sand.u32 (!%p1304_p13), 1, %s999_s19   ;;  %p1305_p0 = scmp.ne.s32.totalorder (!%p1304_p13), %s1300_s30, 0 }
  0x6e   : > { %247 = sbr.rel (%p1304_p13) target bundleno = 756 (0x2f4), region = 40  ;;  %s669_s10 = sshll.u32 (!%p1304_p13), %s249_s8, 5 }
  0x6f   : > { %s250_s13 = scalar_lea.sflag (!%p1304_p13), [#allocation4], %s249_s8  ;;  %s253_s14 = scalar_lea.vmem (!%p1304_p13), [#allocation3], %s669_s10 }
  0x75   : > { %982 = dma.done.wait (%p1305_p0), %s250_s13, 512  }
  0x76   : > { %984 = vsyncadd (%p1305_p0), %s250_s13, 4294966784  ;;  %p1306_p12 = scmp.ne.s32.totalorder %s1299_s29, 0 }
  0x78   : > { %986 = dma.done.wait (%p1306_p12), [#allocation7], 2112  }
  0x79   : > { %988 = vsyncadd (%p1306_p12), [#allocation7], 4294965184  ;;  %p672_p5 = scmp.ne.s32.totalorder %s1007_s21, 0 }
  0x7a   : > { %vm290_vm0 = vcmask (!%p672_p5), 31744   ;;  %v1025_v0 = vmov (!%p672_p5), 0.0  }
  0x7b   : > { %289 = sbr.rel (%p672_p5) target bundleno = 130 (0x82), region = 56  ;;  %291 = vst.msk [vmem:[#allocation2] sm:$0xff] (!%p672_p5), %vm290_vm0, %v1025_v0 }
  0x82 PF: > { %v293_v1 = vld [vmem:[%s253_s14] sm:$0xf]  ;;  %vm301_vm1 = vcmask 1043456   ;;  %v295_v2 = vld [vmem:[%s253_s14 + $0x8] sm:$0xf]  ;;  %v334_v17 = vlaneseq  ;;  %vm368_vm2 = vcmask 1041409  }
  0x83   : > { %v302_v3 = vsel %vm301_vm1, %v293_v1, 0.0  ;;  %v308_v4 = vsel %vm301_vm1, %v295_v2, 0.0  ;;  %v294_v5 = vld [vmem:[%s253_s14 + $0x4] sm:$0xf]  ;;  %v296_v6 = vld [vmem:[%s253_s14 + $0xc] sm:$0xf] }
  0x84   : > { %303 = vadd.xlane.f32.xlu0 %v302_v3  ;;  %309 = vadd.xlane.f32.xlu1 %v308_v4  ;;  %v305_v7 = vsel %vm301_vm1, %v294_v5, 0.0  ;;  %v311_v8 = vsel %vm301_vm1, %v296_v6, 0.0  ;;  %v297_v9 = vld [vmem:[%s253_s14 + $0x10] sm:$0xf]  ;;  %v298_v10 = vld [vmem:[%s253_s14 + $0x14] sm:$0xf] }
  0x85   : > { %v314_v11 = vsel %vm301_vm1, %v297_v9, 0.0  ;;  %v317_v12 = vsel %vm301_vm1, %v298_v10, 0.0  ;;  %v299_v13 = vld [vmem:[%s253_s14 + $0x18] sm:$0xf]  ;;  %v300_v14 = vld [vmem:[%s253_s14 + $0x1c] sm:$0xf] }
  0x86   : > { %v320_v15 = vsel %vm301_vm1, %v299_v13, 0.0  ;;  %v323_v16 = vsel %vm301_vm1, %v300_v14, 0.0  ;;  %v335_v18 = vand.u32 127, %v334_v17  ;;  %v337_v19 = vshrl.u32 %v334_v17, 7  ;;  %v292_v42 = vld [vmem:[#allocation2] sm:$0xff]  ;;  %p673_p8 = scmp.ne.s32.totalorder %s1007_s21, 1 }
  0x87   : > { %vm370_vm3 = vcmask 1042434   ;;  %vm372_vm4 = vcmask 1043459   ;;  %vm374_vm5 = vcmask 1044484   ;;  %vm376_vm6 = vcmask 1045509   ;;  %v391_v46 = vld [vmem:[#allocation6] sm:$0xf] (!%p673_p8) }
  0x88   : > { %306 = vadd.xlane.f32.xlu0 %v305_v7  ;;  %312 = vadd.xlane.f32.xlu1 %v311_v8  ;;  %v338_v22 = vsub.s32 %v335_v18, %v337_v19  ;;  %vm378_vm7 = vcmask 1046534   ;;  %vm380_vm8 = vcmask 1047559   ;;  %vm384_vm9 = vcmask 31744   ;;  %v476_v49 = vld [vmem:[#allocation8] sm:$0xff] (!%p673_p8)  ;;  %v477_v50 = vld [vmem:[#allocation8 + $0x8] sm:$0xff] (!%p673_p8)  ;;  %v478_v51 = vld [vmem:[#allocation8 + $0x10] sm:$0xff] (!%p673_p8) }
  0x89   : > { %v1026_v48 = vmov (!%p673_p8), 0.0   ;;  %vm1027_vm10 = vmmov (!%p673_p8), 0   ;;  %v1028_v52 = vmov (!%p673_p8), 0.0|0.0   ;;  %v742_v53 = vpack.c.bf16 (!%p673_p8), %v477_v50, %v476_v49  ;;  %v479_v54 = vld [vmem:[#allocation8 + $0x18] sm:$0xff] (!%p673_p8)  ;;  %v480_v56 = vld [vmem:[#allocation8 + $0x20] sm:$0xff] (!%p673_p8)  ;;  %v481_v57 = vld [vmem:[#allocation8 + $0x28] sm:$0xff] (!%p673_p8) }
  0x8a   : > { %701 = vmatprep.subr.mxu0 (!%p673_p8), %v1026_v48  ;;  %703 = vmatprep.mubr.msk.f32.mxu0 (!%p673_p8), %vm1027_vm10, %v1026_v48  ;;  %v745_v55 = vpack.c.bf16 (!%p673_p8), %v479_v54, %v478_v51  ;;  %v748_v58 = vpack.c.bf16 (!%p673_p8), %v481_v57, %v480_v56  ;;  %v482_v59 = vld [vmem:[#allocation8 + $0x30] sm:$0xff] (!%p673_p8)  ;;  %v483_v60 = vld [vmem:[#allocation8 + $0x38] sm:$0xff] (!%p673_p8)  ;;  %v484_v62 = vld [vmem:[#allocation8 + $0x40] sm:$0xff] (!%p673_p8) }
  0x8b   : > { %702 = vmatpush3.msk.msra.mxu0 (!%p673_p8), %vm301_vm1, %v391_v46  ;;  %741 = vmatprep.subr.bf16.mxu1 (!%p673_p8), %v1028_v52  ;;  %v751_v61 = vpack.c.bf16 (!%p673_p8), %v483_v60, %v482_v59  ;;  %v485_v63 = vld [vmem:[#allocation8 + $0x48] sm:$0xff] (!%p673_p8)  ;;  %v486_v1 = vld [vmem:[#allocation8 + $0x50] sm:$0xff] (!%p673_p8)  ;;  %v487_v2 = vld [vmem:[#allocation8 + $0x58] sm:$0xff] (!%p673_p8) }
  0x8c   : > { %315 = vadd.xlane.f32.xlu0 %v314_v11  ;;  %318 = vadd.xlane.f32.xlu1 %v317_v12  ;;  %v754_v0 = vpack.c.bf16 (!%p673_p8), %v485_v63, %v484_v62  ;;  %v757_v3 = vpack.c.bf16 (!%p673_p8), %v487_v2, %v486_v1  ;;  %v488_v4 = vld [vmem:[#allocation8 + $0x60] sm:$0xff] (!%p673_p8)  ;;  %v489_v5 = vld [vmem:[#allocation8 + $0x68] sm:$0xff] (!%p673_p8)  ;;  %v490_v7 = vld [vmem:[#allocation8 + $0x70] sm:$0xff] (!%p673_p8) }
  0x8d   : > { %738 = vmatprep.mubr.msk.f32.mxu1 (!%p673_p8), %vm1027_vm10, %v1026_v48  ;;  %743 = vmatpush3.bf16.msra.mxu1 (!%p673_p8), %v742_v53  ;;  %v760_v6 = vpack.c.bf16 (!%p673_p8), %v489_v5, %v488_v4  ;;  %v491_v8 = vld [vmem:[#allocation8 + $0x78] sm:$0xff] (!%p673_p8)  ;;  %v674_v10 = vld [vmem:[%s1290_s2] ss:$0 sm:$0xff] (!%p673_p8) }
  0x8e   : > { %744 = vmatprep.subr.bf16.mxu1 (!%p673_p8), %v1028_v52  ;;  %v763_v9 = vpack.c.bf16 (!%p673_p8), %v491_v8, %v490_v7 }
  0x90   : > { %321 = vadd.xlane.f32.xlu0 %v320_v15  ;;  %324 = vadd.xlane.f32.xlu1 %v323_v16  ;;  %v677_v15 = vld [vmem:[%s1292_s4] ss:$0 sm:$0xff] (!%p673_p8) }
  0x91   : > { %746 = vmatpush3.bf16.msra.mxu1 (!%p673_p8), %v745_v55 }
  0x92   : > { %747 = vmatprep.subr.bf16.mxu1 (!%p673_p8), %v1028_v52 }
  0x95   : > { %749 = vmatpush3.bf16.msra.mxu1 (!%p673_p8), %v748_v58 }
  0x96   : > { %750 = vmatprep.subr.bf16.mxu1 (!%p673_p8), %v1028_v52 }
  0x99   : > { %752 = vmatpush3.bf16.msra.mxu1 (!%p673_p8), %v751_v61 }
  0x9a   : > { %753 = vmatprep.subr.bf16.mxu1 (!%p673_p8), %v1028_v52 }
  0x9d   : > { %755 = vmatpush3.bf16.msra.mxu1 (!%p673_p8), %v754_v0 }
  0x9e   : > { %756 = vmatprep.subr.bf16.mxu1 (!%p673_p8), %v1028_v52 }
  0xa1   : > { %758 = vmatpush3.bf16.msra.mxu1 (!%p673_p8), %v757_v3 }
  0xa2   : > { %759 = vmatprep.subr.bf16.mxu1 (!%p673_p8), %v1028_v52 }
  0xa5   : > { %761 = vmatpush3.bf16.msra.mxu1 (!%p673_p8), %v760_v6 }
  0xa6   : > { %762 = vmatprep.subr.bf16.mxu1 (!%p673_p8), %v1028_v52 }
  0xa9   : > { %764 = vmatpush3.bf16.msra.mxu1 (!%p673_p8), %v763_v9 }
 0x111   : > { %v304_v20 = vpop.xlane.xlu0 %303  ;;  %v310_v21 = vpop.xlane.xlu1 %309 }
 0x112   : > { %v339_v25 = vrot.slane %v304_v20, %v338_v22  ;;  %v347_v28 = vrot.slane %v310_v21, %v338_v22 }
 0x115   : > { %v307_v23 = vpop.xlane.xlu0 %306  ;;  %v313_v24 = vpop.xlane.xlu1 %312 }
 0x116   : > { %v343_v26 = vrot.slane %v307_v23, %v338_v22  ;;  %v351_v27 = vrot.slane %v313_v24, %v338_v22 }
 0x118   : > { %v369_v29 = vsel %vm368_vm2, %v343_v26, %v339_v25 }
 0x119   : > { %v371_v30 = vsel %vm370_vm3, %v347_v28, %v369_v29  ;;  %v316_v31 = vpop.xlane.xlu0 %315  ;;  %v319_v32 = vpop.xlane.xlu1 %318 }
 0x11a   : > { %v373_v33 = vsel %vm372_vm4, %v351_v27, %v371_v30  ;;  %v355_v34 = vrot.slane %v316_v31, %v338_v22  ;;  %v359_v35 = vrot.slane %v319_v32, %v338_v22 }
 0x11c   : > { %v375_v36 = vsel %vm374_vm5, %v355_v34, %v373_v33 }
 0x11d   : > { %v322_v37 = vpop.xlane.xlu0 %321  ;;  %v325_v38 = vpop.xlane.xlu1 %324  ;;  %v377_v41 = vsel %vm376_vm6, %v359_v35, %v375_v36 }
 0x11e   : > { %v363_v39 = vrot.slane %v322_v37, %v338_v22  ;;  %v367_v40 = vrot.slane %v325_v38, %v338_v22  ;;  %389 = sbr.rel (%p673_p8) target bundleno = 731 (0x2db), region = 60 }
 0x120   : > { %v379_v43 = vsel %vm378_vm7, %v363_v39, %v377_v41 }
 0x121   : > { %v381_v44 = vsel %vm380_vm8, %v367_v40, %v379_v43 }
 0x122   : > { %v383_v45 = vadd.f32 %v381_v44, %v292_v42 }
 0x124   : > { %385 = vst.msk [vmem:[#allocation2] sm:$0xff] %vm384_vm9, %v383_v45 }
 0x12b   : > { %v390_v47 = vld [vmem:[#allocation2] sm:$0xff] }
 0x12c   : > { %704 = vmatmul.mubr.msk.f32.vlgmr.msra.gmra.mrb[0].mxu0 %vm384_vm9, %v390_v47 }
 0x1ff   : > { %v471_v11 = vpop.f32.mrb[0].mxu0 }
 0x200   : > { %v472_v12 = vadd.f32 %v674_v10, %v471_v11  ;;  %v705_v13 = vpop.f32.mrb[1].mxu0 }
 0x202   : > { %v475_v14 = vmax.f32 %v472_v12, 0.0 }
 0x204   : > { %739 = vmatmul.mubr.f32.vlgmr.msra.gmra.mrb[0].mxu1 %v475_v14 }
 0x2d7   : > { %v565_v16 = vpop.f32.mrb[0].mxu1 }
 0x2d8   : > { %v566_v17 = vadd.f32 %v677_v15, %v565_v16  ;;  %v740_v18 = vpop.f32.mrb[1].mxu1 }
 0x2da   : > { %569 = vst [vmem:[#allocation9] sm:$0xff] %v566_v17 }
 0x2db PF: > { %p1244_p3 = scmp.eq.s32.totalorder %s661_s24, 1  ;;  %s1029_s18 = smov [#allocation9]  }
 0x2dc   : > { %s579_s11 = sshll.u32 %s1029_s18, 4  ;;  %s580_s11 = int_to_ptr.vmem [resolvable:$true] %s579_s11 }
 0x2dd   : > { %s931_s15 = scalar_lea.vmem %s580_s11, 128  ;;  %p938_p4 = scmp.lt.s32.totalorder %s580_s11, %s580_s11 }
 0x2de   : > { %p932_p10 = scmp.ne.s32.totalorder %s580_s11, %s931_s15  ;;  %p939_p6 = scmp.lt.s32.totalorder %s931_s15, %s931_s15 }
 0x2e0   : > { %p933_p1 = pnand %p932_p10, %p1244_p3  ;;  %p940_p7 = por %p939_p6, %p938_p4 }
 0x2e2   : > { %p934_p2 = pneg %p933_p1 }
 0x2e4   : > { %p941_p9 = pnand %p940_p7, %p934_p2 }
 0x2e6   : > { %944 = shalt.err (!%p941_p9)
}
 0x2e7   : > { %s945_s24 = scalar_lea.hbm %s1293_s5, 128 }
 0x2e8   : > { %p946_p11 = scmp.ne.s32.totalorder %s1293_s5, %s945_s24  ;;  %p951_p12 = scmp.lt.u32.totalorder %s945_s24, %s1293_s5 }
 0x2ea   : > { %p947_p13 = pnand %p946_p11, %p1244_p3 }
 0x2ec   : > { %p948_p0 = pneg %p947_p13 }
 0x2ee   : > { %p953_p5 = pnand %p951_p12, %p948_p0 }
 0x2f0   : > { %956 = shalt.err (!%p953_p5)
}
 0x2f1   : > { %775 = dma.vmem_to_hbm [thread:$0]  (%p1244_p3), %s580_s11, 128, %s1293_s5, [#allocation5]  }
 0x2f2   : > { %990 = dma.done.wait (%p1244_p3), [#allocation5], 128  }
 0x2f3   : > { %992 = vsyncadd (%p1244_p3), [#allocation5], 4294967168 }
 0x2f4 PF: > { %s20_s23 = sadd.s32 1, %s1015_s23   ;;  %s1308_s18 = smov %s999_s19 }
 0x2f5   : > { %p17_p8 = scmp.ge.s32.totalorder %s20_s23, 4   ;;  %s1309_s19 = smov %s1003_s20 }
 0x2f6   : > { %s1310_s20 = smov %s1118_s6  ;;  %s1311_s21 = smov %s1011_s22 }
 0x2f7   : > { %s1312_s22 = smov %s1314_s25  ;;  %19 = sbr.rel (!%p17_p8) target bundleno = 6 (0x6), region = 94 }
 0x2fe   :  { %592 = vsyncpa [#allocation4], 1 }
 0x2ff   :  { %594 = vsyncpa [#allocation4 + $0x1], 1 }
 0x300   :  { %595 = vsyncpa [#allocation7], 1 }
 0x301   :  { %596 = vsyncpa [#allocation5], 1 }
 0x302   :  { %598 = vsyncpa [#allocation5 + $0x1], 1 }

</bundles_post_ra>
